<compile_context>
chip_gen: v7x
topology: tpu7x:2x2x1
jax: 0.10.0
libtpu: 0.0.40
codegen_flags: <defaults>
</compile_context>

<pallas_src>
import functools

import jax
import jax.numpy as jnp
from jax.experimental import pallas as pl
from jax.experimental.pallas import tpu as pltpu


def _round_up(x, k):
    return -(-x // k) * k


def _ttnet_fused_kernel(state_ref, x_ref, e_ref, w_ref, out_ref, *,
                        n_classes, n_div):
    """All D serialized TT contractions + log_softmax for one batch tile.

    state_ref: (Bt, r_pad)     f32 initial state (zero-padded columns)
    x_ref:     (D, Bt, KM)     f32 host-pretiled input, x[d,b,i*m+k] = x_d[b,k]
    e_ref:     (r_pad, KM)     f32 0/1 expansion matrix, E[i, i*m+k] = 1
    w_ref:     (D, KM, r_pad)  f32 flattened, zero-padded TT cores (i-major)
    out_ref:   (Bt, r_pad)     f32 log-probs (columns >= n_classes are junk)
    """
    st = state_ref[...]                                     # (Bt, r_pad)
    e = e_ref[...]                                          # (r_pad, KM)

    # D is small and known at trace time: fully unrolled; the running state is
    # a loop-carried value (no VMEM scratch round-trip between divisions).
    for d in range(n_div):
        st_rep = jnp.dot(st, e, preferred_element_type=jnp.float32)    # (Bt, KM)
        z = st_rep * x_ref[d]                                           # (Bt, KM)
        st = jnp.dot(z, w_ref[d], preferred_element_type=jnp.float32)   # (Bt, r_pad)

    # F.log_softmax(state, dim=1), masking the zero-padded class columns.
    col = jax.lax.broadcasted_iota(jnp.int32, st.shape, 1)
    logits = jnp.where(col < n_classes, st, jnp.float32(-1e30))
    mx = jnp.max(logits, axis=1, keepdims=True)
    shifted = logits - mx
    lse = jnp.log(jnp.sum(jnp.exp(shifted), axis=1, keepdims=True))
    out_ref[...] = (shifted - lse).astype(out_ref.dtype)


def _pick_r_pad(max_rank, m):
    """Smallest multiple of 8 >= max_rank whose product with m is lane-dense."""
    r = _round_up(max_rank, 8)
    cand = r
    while cand <= max(r, 512):
        if (cand * m) % 128 == 0:
            return cand
        cand += 8
    return r                      # fallback: sublane-aligned only


def _pick_b_tile(B, n_div, km):
    """Batch tile: multiple of 8, large (amortize overhead), >=2 tiles when
    B >= 16 (v7x has 2 TensorCores on the 'parallel' axis), VMEM-safe."""
    if B <= 8:
        return 8
    tile = min(1024, _round_up(_round_up(B, 2) // 2, 8))    # >= 2 tiles, cap 1024
    # Keep the (double-buffered) f32 x slab comfortably under VMEM.
    budget = 24 * 1024 * 1024
    row_bytes = 2 * n_div * km * 4
    max_rows = max(8, (budget // row_bytes) // 8 * 8)
    return max(8, min(tile, max_rows))


def ttnet_forward(tensor, state, cores):
    """tensor: (D, B, m), state: (B_state, r0), cores[d]: (r_d, m, r_{d+1})."""
    D, B, m = tensor.shape
    assert state.shape[0] >= B, "state.narrow(0, 0, B) requires B_state >= B"
    ranks = [cores[0].shape[0]] + [c.shape[2] for c in cores]
    n = ranks[-1]

    r_pad = _pick_r_pad(max(ranks), m)
    km = r_pad * m
    b_tile = _pick_b_tile(B, D, km)
    b_pad = _round_up(B, b_tile)

    # Initial state: narrow to B rows, zero-pad to (b_pad, r_pad).
    st0 = jnp.zeros((b_pad, r_pad), jnp.float32)
    st0 = st0.at[:B, :ranks[0]].set(state[:B].astype(jnp.float32))

    # Host-pretiled input (i-major, lane-dense last dim): x_tiled[d,b,i*m+k] = x[d,b,k].
    x_tiled = jnp.tile(tensor.astype(jnp.float32), (1, 1, r_pad))        # (D, B, KM)
    if b_pad > B:
        x_tiled = jnp.pad(x_tiled, ((0, 0), (0, b_pad - B), (0, 0)))

    # Flattened, zero-padded cores: (D, KM, r_pad), i-major rows (matches x_tiled).
    w_list = []
    for c in cores:
        r_i, _, r_j = c.shape
        cpad = jnp.zeros((r_pad, m, r_pad), jnp.float32)
        cpad = cpad.at[:r_i, :, :r_j].set(c.astype(jnp.float32))
        w_list.append(cpad.reshape(km, r_pad))
    w_stack = jnp.stack(w_list)                                          # (D, KM, r_pad)

    # 0/1 expansion matrix (exact in f32): E[i, i*m+k] = 1.
    cols = jnp.arange(km)
    e_mat = (cols[None, :] // m == jnp.arange(r_pad)[:, None]).astype(jnp.float32)

    grid = (b_pad // b_tile,)
    kernel = functools.partial(_ttnet_fused_kernel, n_classes=n, n_div=D)

    out_padded = pl.pallas_call(
        kernel,
        out_shape=jax.ShapeDtypeStruct((b_pad, r_pad), jnp.float32),
        grid_spec=pltpu.PrefetchScalarGridSpec(
            num_scalar_prefetch=0,
            grid=grid,
            in_specs=[
                pl.BlockSpec((b_tile, r_pad), lambda b: (b, 0)),       # state
                pl.BlockSpec((D, b_tile, km), lambda b: (0, b, 0)),    # x, all divisions
                pl.BlockSpec((r_pad, km), lambda b: (0, 0)),           # E
                pl.BlockSpec((D, km, r_pad), lambda b: (0, 0, 0)),     # cores
            ],
            out_specs=pl.BlockSpec((b_tile, r_pad), lambda b: (b, 0)),
        ),
        compiler_params=pltpu.CompilerParams(
            dimension_semantics=("parallel",)),
    )(st0, x_tiled, e_mat, w_stack)

    return out_padded[:B, :n]


def ttnet_reference(tensor, state, cores):
    """Pure-JAX f32 reference mirroring the module's serialized TT contraction."""
    D, B, m = tensor.shape
    st = state[:B].astype(jnp.float32)
    for d, core in enumerate(cores):
        r_i, _, r_j = core.shape
        z = (st[:, :, None] * tensor[d][:, None, :]).reshape(B, r_i * m)
        st = jnp.dot(z, core.reshape(r_i * m, r_j))
    return jax.nn.log_softmax(st, axis=1)


if __name__ == "__main__":
    key = jax.random.PRNGKey(0)

    # Module-consistent small shapes:
    #   amount_of_divisions D = 4, embedding m = 4, batch B = 8,
    #   ranks = [8, 8, 8, 8, n=10]  ->  len(ranks) - 1 = D kernels.
    D, B, m, n_classes = 4, 8, 4, 10
    ranks = [8, 8, 8, 8, n_classes]

    k_in, k_state, *k_cores = jax.random.split(key, 2 + D)
    tensor = jax.random.normal(k_in, (D, B, m), dtype=jnp.float32)
    state = jax.random.normal(k_state, (B, ranks[0]), dtype=jnp.float32)
    cores = [
        jax.random.normal(k_cores[d], (ranks[d], m, ranks[d + 1]), dtype=jnp.float32)
        / jnp.sqrt(float(ranks[d] * m))
        for d in range(D)
    ]

    out = jax.block_until_ready(ttnet_forward(tensor, state, cores))
    ref = jax.block_until_ready(ttnet_reference(tensor, state, cores))

    assert out.shape == (B, n_classes)
    # log_softmax sanity: rows of exp(out) sum to 1
    assert bool(jnp.allclose(jnp.sum(jnp.exp(out), axis=1), 1.0, atol=1e-4))
    # matches the pure-JAX f32 reference
    assert bool(jnp.allclose(out, ref, atol=1e-2, rtol=1e-2))
    print("KERNEL_OK")
</pallas_src>

<mosaic_0001>
module attributes {stable_mosaic.version = 11 : i64} {
  func.func @_ttnet_fused_kernel(%arg0: i32, %arg1: memref<8x32xf32, #tpu.memory_space<vmem>>, %arg2: memref<4x8x128xf32, #tpu.memory_space<vmem>>, %arg3: memref<32x128xf32, #tpu.memory_space<vmem>>, %arg4: memref<4x128x32xf32, #tpu.memory_space<vmem>>, %arg5: memref<8x32xf32, #tpu.memory_space<vmem>>) attributes {dimension_semantics = [#tpu.dimension_semantics<parallel>], iteration_bounds = array<i64: 1>, scalar_prefetch = 0 : i64, scratch_operands = 0 : i64, tpu.core_type = #tpu.core_type<tc>, window_params = [{transform_indices = @transform_0, window_bounds = array<i64: 8, 32>}, {transform_indices = @transform_1, window_bounds = array<i64: 4, 8, 128>}, {pipeline_mode = #tpu.pipeline_mode<synchronous>, transform_indices = @transform_2, window_bounds = array<i64: 32, 128>}, {pipeline_mode = #tpu.pipeline_mode<synchronous>, transform_indices = @transform_3, window_bounds = array<i64: 4, 128, 32>}, {transform_indices = @transform_4, window_bounds = array<i64: 8, 32>}]} {
    %c0 = arith.constant 0 : index
    %c0_0 = arith.constant 0 : index
    %0 = vector.load %arg1[%c0, %c0_0] : memref<8x32xf32, #tpu.memory_space<vmem>>, vector<8x32xf32>
    %c0_1 = arith.constant 0 : index
    %c0_2 = arith.constant 0 : index
    %1 = vector.load %arg3[%c0_1, %c0_2] : memref<32x128xf32, #tpu.memory_space<vmem>>, vector<32x128xf32>
    %cst = arith.constant dense<0.000000e+00> : vector<8x128xf32>
    %2 = tpu.matmul %0, %1, %cst {dimension_numbers = #tpu.dot_dimension_numbers<[1], [0], [0], [1], [0, 0, 1, 1], [], []>} : vector<8x32xf32>, vector<32x128xf32>, vector<8x128xf32> -> vector<8x128xf32>
    %c0_3 = arith.constant 0 : index
    %c0_4 = arith.constant 0 : index
    %c0_5 = arith.constant 0 : index
    %3 = vector.load %arg2[%c0_3, %c0_4, %c0_5] : memref<4x8x128xf32, #tpu.memory_space<vmem>>, vector<1x8x128xf32>
    %4 = vector.shape_cast %3 : vector<1x8x128xf32> to vector<8x128xf32>
    %5 = arith.mulf %2, %4 : vector<8x128xf32>
    %c0_6 = arith.constant 0 : index
    %c0_7 = arith.constant 0 : index
    %c0_8 = arith.constant 0 : index
    %6 = vector.load %arg4[%c0_6, %c0_7, %c0_8] : memref<4x128x32xf32, #tpu.memory_space<vmem>>, vector<1x128x32xf32>
    %7 = vector.shape_cast %6 : vector<1x128x32xf32> to vector<128x32xf32>
    %cst_9 = arith.constant dense<0.000000e+00> : vector<8x32xf32>
    %8 = tpu.matmul %5, %7, %cst_9 {dimension_numbers = #tpu.dot_dimension_numbers<[1], [0], [0], [1], [0, 0, 1, 1], [], []>} : vector<8x128xf32>, vector<128x32xf32>, vector<8x32xf32> -> vector<8x32xf32>
    %cst_10 = arith.constant dense<0.000000e+00> : vector<8x128xf32>
    %9 = tpu.matmul %8, %1, %cst_10 {dimension_numbers = #tpu.dot_dimension_numbers<[1], [0], [0], [1], [0, 0, 1, 1], [], []>} : vector<8x32xf32>, vector<32x128xf32>, vector<8x128xf32> -> vector<8x128xf32>
    %c1 = arith.constant 1 : index
    %c0_11 = arith.constant 0 : index
    %c0_12 = arith.constant 0 : index
    %10 = vector.load %arg2[%c1, %c0_11, %c0_12] : memref<4x8x128xf32, #tpu.memory_space<vmem>>, vector<1x8x128xf32>
    %11 = vector.shape_cast %10 : vector<1x8x128xf32> to vector<8x128xf32>
    %12 = arith.mulf %9, %11 : vector<8x128xf32>
    %c1_13 = arith.constant 1 : index
    %c0_14 = arith.constant 0 : index
    %c0_15 = arith.constant 0 : index
    %13 = vector.load %arg4[%c1_13, %c0_14, %c0_15] : memref<4x128x32xf32, #tpu.memory_space<vmem>>, vector<1x128x32xf32>
    %14 = vector.shape_cast %13 : vector<1x128x32xf32> to vector<128x32xf32>
    %cst_16 = arith.constant dense<0.000000e+00> : vector<8x32xf32>
    %15 = tpu.matmul %12, %14, %cst_16 {dimension_numbers = #tpu.dot_dimension_numbers<[1], [0], [0], [1], [0, 0, 1, 1], [], []>} : vector<8x128xf32>, vector<128x32xf32>, vector<8x32xf32> -> vector<8x32xf32>
    %cst_17 = arith.constant dense<0.000000e+00> : vector<8x128xf32>
    %16 = tpu.matmul %15, %1, %cst_17 {dimension_numbers = #tpu.dot_dimension_numbers<[1], [0], [0], [1], [0, 0, 1, 1], [], []>} : vector<8x32xf32>, vector<32x128xf32>, vector<8x128xf32> -> vector<8x128xf32>
    %c2 = arith.constant 2 : index
    %c0_18 = arith.constant 0 : index
    %c0_19 = arith.constant 0 : index
    %17 = vector.load %arg2[%c2, %c0_18, %c0_19] : memref<4x8x128xf32, #tpu.memory_space<vmem>>, vector<1x8x128xf32>
    %18 = vector.shape_cast %17 : vector<1x8x128xf32> to vector<8x128xf32>
    %19 = arith.mulf %16, %18 : vector<8x128xf32>
    %c2_20 = arith.constant 2 : index
    %c0_21 = arith.constant 0 : index
    %c0_22 = arith.constant 0 : index
    %20 = vector.load %arg4[%c2_20, %c0_21, %c0_22] : memref<4x128x32xf32, #tpu.memory_space<vmem>>, vector<1x128x32xf32>
    %21 = vector.shape_cast %20 : vector<1x128x32xf32> to vector<128x32xf32>
    %cst_23 = arith.constant dense<0.000000e+00> : vector<8x32xf32>
    %22 = tpu.matmul %19, %21, %cst_23 {dimension_numbers = #tpu.dot_dimension_numbers<[1], [0], [0], [1], [0, 0, 1, 1], [], []>} : vector<8x128xf32>, vector<128x32xf32>, vector<8x32xf32> -> vector<8x32xf32>
    %cst_24 = arith.constant dense<0.000000e+00> : vector<8x128xf32>
    %23 = tpu.matmul %22, %1, %cst_24 {dimension_numbers = #tpu.dot_dimension_numbers<[1], [0], [0], [1], [0, 0, 1, 1], [], []>} : vector<8x32xf32>, vector<32x128xf32>, vector<8x128xf32> -> vector<8x128xf32>
    %c3 = arith.constant 3 : index
    %c0_25 = arith.constant 0 : index
    %c0_26 = arith.constant 0 : index
    %24 = vector.load %arg2[%c3, %c0_25, %c0_26] : memref<4x8x128xf32, #tpu.memory_space<vmem>>, vector<1x8x128xf32>
    %25 = vector.shape_cast %24 : vector<1x8x128xf32> to vector<8x128xf32>
    %26 = arith.mulf %23, %25 : vector<8x128xf32>
    %c3_27 = arith.constant 3 : index
    %c0_28 = arith.constant 0 : index
    %c0_29 = arith.constant 0 : index
    %27 = vector.load %arg4[%c3_27, %c0_28, %c0_29] : memref<4x128x32xf32, #tpu.memory_space<vmem>>, vector<1x128x32xf32>
    %28 = vector.shape_cast %27 : vector<1x128x32xf32> to vector<128x32xf32>
    %cst_30 = arith.constant dense<0.000000e+00> : vector<8x32xf32>
    %29 = tpu.matmul %26, %28, %cst_30 {dimension_numbers = #tpu.dot_dimension_numbers<[1], [0], [0], [1], [0, 0, 1, 1], [], []>} : vector<8x128xf32>, vector<128x32xf32>, vector<8x32xf32> -> vector<8x32xf32>
    %30 = tpu.iota {dimensions = array<i32: 1>} : vector<8x32xi32>
    %c10_i32 = arith.constant 10 : i32
    %31 = vector.broadcast %c10_i32 : i32 to vector<8x32xi32>
    %32 = arith.cmpi slt, %30, %31 : vector<8x32xi32>
    %cst_31 = arith.constant -1.000000e+30 : f32
    %33 = vector.broadcast %cst_31 : f32 to vector<8x32xf32>
    %34 = arith.select %32, %29, %33 : vector<8x32xi1>, vector<8x32xf32>
    %cst_32 = arith.constant dense<0xFF800000> : vector<8xf32>
    %35 = vector.multi_reduction <maximumf>, %34, %cst_32 [1] : vector<8x32xf32> to vector<8xf32>
    %36 = vector.shape_cast %35 : vector<8xf32> to vector<8x1xf32>
    %37 = vector.broadcast %36 : vector<8x1xf32> to vector<8x32xf32>
    %38 = arith.subf %34, %37 : vector<8x32xf32>
    %39 = math.exp %38 : vector<8x32xf32>
    %cst_33 = arith.constant dense<0.000000e+00> : vector<8xf32>
    %40 = vector.multi_reduction <add>, %39, %cst_33 [1] : vector<8x32xf32> to vector<8xf32>
    %41 = vector.shape_cast %40 : vector<8xf32> to vector<8x1xf32>
    %42 = math.log %41 : vector<8x1xf32>
    %43 = vector.broadcast %42 : vector<8x1xf32> to vector<8x32xf32>
    %44 = arith.subf %38, %43 : vector<8x32xf32>
    %c0_34 = arith.constant 0 : index
    %c0_35 = arith.constant 0 : index
    %45 = vector.load %arg5[%c0_34, %c0_35] : memref<8x32xf32, #tpu.memory_space<vmem>>, vector<8x32xf32>
    tpu.vector_store %arg5[%c0_34, %c0_35], %44 {strides = array<i32>} : memref<8x32xf32, #tpu.memory_space<vmem>>, vector<8x32xf32>,
    return
  }
  func.func @transform_0(%arg0: i32) -> (i32, i32) {
    %c0_i32 = arith.constant 0 : i32
    %c0_i32_0 = arith.constant 0 : i32
    return %arg0, %c0_i32 : i32, i32
  }
  func.func @transform_1(%arg0: i32) -> (i32, i32, i32) {
    %c0_i32 = arith.constant 0 : i32
    %c0_i32_0 = arith.constant 0 : i32
    %c0_i32_1 = arith.constant 0 : i32
    return %c0_i32, %arg0, %c0_i32_0 : i32, i32, i32
  }
  func.func @transform_2(%arg0: i32) -> (i32, i32) {
    %c0_i32 = arith.constant 0 : i32
    %c0_i32_0 = arith.constant 0 : i32
    %c0_i32_1 = arith.constant 0 : i32
    return %c0_i32, %c0_i32_0 : i32, i32
  }
  func.func @transform_3(%arg0: i32) -> (i32, i32, i32) {
    %c0_i32 = arith.constant 0 : i32
    %c0_i32_0 = arith.constant 0 : i32
    %c0_i32_1 = arith.constant 0 : i32
    %c0_i32_2 = arith.constant 0 : i32
    return %c0_i32, %c0_i32_0, %c0_i32_1 : i32, i32, i32
  }
  func.func @transform_4(%arg0: i32) -> (i32, i32) {
    %c0_i32 = arith.constant 0 : i32
    %c0_i32_0 = arith.constant 0 : i32
    return %arg0, %c0_i32 : i32, i32
  }
}

</mosaic_0001>

<bundles_post_ra>
// kernel: tpu_custom_call.1
= control target key start
LH: loop header
LB: loop body
LE: loop exit
PB: predicated region body
PF: predicated region fallthrough
CT: control target
= control target key end

     0   :  { %v1184_v3 = vmov 0.0|0.0   ;;  %vm1185_vm0 = vmmov 0   ;;  %v1186_v6 = vmov 0.0   ;;  %s1519_s0 = inlined_call_operand.vmem [shape: f32[8,32], index: 0, kind: input, shape index: {}]   ;;  %s1520_s1 = inlined_call_operand.vmem [shape: f32[4,8,128], index: 1, kind: input, shape index: {}]   ;;  %s1521_s2 = inlined_call_operand.vmem [shape: f32[32,128], index: 2, kind: input, shape index: {}]   ;;  %s1522_s3 = inlined_call_operand.vmem [shape: f32[4,128,32], index: 3, kind: input, shape index: {}]   ;;  %s1523_s4 = inlined_call_operand.hbm [shape: f32[8,32], index: 4, kind: output, shape index: {}]  }
   0x1   :  { %v19_v0 = vld [vmem:[%s1521_s2] sm:$0xff]  ;;  %v20_v1 = vld [vmem:[%s1521_s2 + $0x8] sm:$0xff]  ;;  %v21_v2 = vld [vmem:[%s1521_s2 + $0x10] sm:$0xff]  ;;  %1032 = vmatprep.subr.bf16.mxu1 %v1184_v3  ;;  %856 = vmatprep.mubr.msk.f32.mxu1 %vm1185_vm0, %v1186_v6 }
   0x2   :  { %v1223_v4 = vpack.c.bf16 %v20_v1, %v19_v0  ;;  %v22_v5 = vld [vmem:[%s1521_s2 + $0x18] sm:$0xff]  ;;  %1062 = vmatprep.subr.bf16.mxu0 %v1184_v3  ;;  %902 = vmatprep.mubr.msk.f32.mxu0 %vm1185_vm0, %v1186_v6  ;;  %v99_v8 = vld [vmem:[%s1522_s3] sm:$0xff]  ;;  %v100_v9 = vld [vmem:[%s1522_s3 + $0x8] sm:$0xff] }
   0x3   :  { %v1234_v7 = vpack.c.bf16 %v22_v5, %v21_v2 }
   0x4   :  { %1034 = vmatpush3.bf16.msra.mxu1 %v1223_v4  ;;  %1064 = vmatpush3.bf16.msra.mxu0 %v1223_v4 }
   0x5   :  { %1035 = vmatprep.subr.bf16.mxu1 %v1184_v3  ;;  %1065 = vmatprep.subr.bf16.mxu0 %v1184_v3 }
   0x6   :  { %9 = vsyncpa [#allocation3], 0  ;;  %v18_v10 = vld [vmem:[%s1519_s0] sm:$0xff]  ;;  %vm23_vm1 = vcmask 261120   ;;  %v1039_v11 = vpack.c.bf16 %v100_v9, %v99_v8  ;;  %v101_v12 = vld [vmem:[%s1522_s3 + $0x10] sm:$0xff] }
   0x7   :  { %v102_v13 = vld [vmem:[%s1522_s3 + $0x18] sm:$0xff]  ;;  %v103_v15 = vld [vmem:[%s1522_s3 + $0x20] sm:$0xff]  ;;  %v104_v16 = vld [vmem:[%s1522_s3 + $0x28] sm:$0xff] }
   0x8   :  { %1037 = vmatpush3.bf16.msra.mxu1 %v1234_v7  ;;  %1067 = vmatpush3.bf16.msra.mxu0 %v1234_v7  ;;  %v1042_v14 = vpack.c.bf16 %v102_v13, %v101_v12  ;;  %v1045_v17 = vpack.c.bf16 %v104_v16, %v103_v15  ;;  %v105_v18 = vld [vmem:[%s1522_s3 + $0x30] sm:$0xff]  ;;  %v106_v19 = vld [vmem:[%s1522_s3 + $0x38] sm:$0xff]  ;;  %v107_v21 = vld [vmem:[%s1522_s3 + $0x40] sm:$0xff] }
   0x9   :  { %1038 = vmatprep.subr.bf16.mxu1 %v1184_v3  ;;  %1068 = vmatprep.subr.bf16.mxu0 %v1184_v3  ;;  %v1048_v20 = vpack.c.bf16 %v106_v19, %v105_v18  ;;  %v108_v22 = vld [vmem:[%s1522_s3 + $0x48] sm:$0xff]  ;;  %v109_v24 = vld [vmem:[%s1522_s3 + $0x50] sm:$0xff]  ;;  %v110_v25 = vld [vmem:[%s1522_s3 + $0x58] sm:$0xff] }
   0xa   :  { %v1051_v23 = vpack.c.bf16 %v108_v22, %v107_v21  ;;  %v1054_v26 = vpack.c.bf16 %v110_v25, %v109_v24  ;;  %v111_v27 = vld [vmem:[%s1522_s3 + $0x60] sm:$0xff]  ;;  %v112_v28 = vld [vmem:[%s1522_s3 + $0x68] sm:$0xff]  ;;  %v113_v30 = vld [vmem:[%s1522_s3 + $0x70] sm:$0xff] }
   0xb   :  { %857 = vmatmul.mubr.msk.f32.vlgmr.msra.gmra.mrb[0].mxu1 %vm23_vm1, %v18_v10  ;;  %v1057_v29 = vpack.c.bf16 %v112_v28, %v111_v27  ;;  %v114_v31 = vld [vmem:[%s1522_s3 + $0x78] sm:$0xff]  ;;  %v97_v33 = vld [vmem:[%s1520_s1] sm:$0xff]  ;;  %v709_v38 = vld [vmem:[%s1522_s3 + $0x88] sm:$0xff] }
   0xc   :  { %1040 = vmatpush3.bf16.msra.mxu1 %v1039_v11  ;;  %891 = vmatprep.mubr.msk.f32.mxu1 %vm1185_vm0, %v1186_v6  ;;  %v1060_v32 = vpack.c.bf16 %v114_v31, %v113_v30  ;;  %v708_v37 = vld [vmem:[%s1522_s3 + $0x80] sm:$0xff]  ;;  %v710_v40 = vld [vmem:[%s1522_s3 + $0x90] sm:$0xff]  ;;  %v711_v41 = vld [vmem:[%s1522_s3 + $0x98] sm:$0xff] }
   0xd   :  { %1041 = vmatprep.subr.bf16.mxu1 %v1184_v3  ;;  %v1069_v39 = vpack.c.bf16 %v709_v38, %v708_v37  ;;  %v1072_v44 = vpack.c.bf16 %v711_v41, %v710_v40  ;;  %v712_v45 = vld [vmem:[%s1522_s3 + $0xa0] sm:$0xff]  ;;  %v713_v46 = vld [vmem:[%s1522_s3 + $0xa8] sm:$0xff]  ;;  %v714_v48 = vld [vmem:[%s1522_s3 + $0xb0] sm:$0xff] }
   0xe   :  { %v1075_v47 = vpack.c.bf16 %v713_v46, %v712_v45  ;;  %v715_v49 = vld [vmem:[%s1522_s3 + $0xb8] sm:$0xff]  ;;  %v716_v51 = vld [vmem:[%s1522_s3 + $0xc0] sm:$0xff]  ;;  %v717_v52 = vld [vmem:[%s1522_s3 + $0xc8] sm:$0xff] }
   0xf   :  { %v1078_v50 = vpack.c.bf16 %v715_v49, %v714_v48  ;;  %v1081_v53 = vpack.c.bf16 %v717_v52, %v716_v51  ;;  %v718_v54 = vld [vmem:[%s1522_s3 + $0xd0] sm:$0xff]  ;;  %v719_v55 = vld [vmem:[%s1522_s3 + $0xd8] sm:$0xff]  ;;  %v720_v57 = vld [vmem:[%s1522_s3 + $0xe0] sm:$0xff] }
  0x10   :  { %1043 = vmatpush3.bf16.msra.mxu1 %v1042_v14  ;;  %v1084_v56 = vpack.c.bf16 %v719_v55, %v718_v54  ;;  %v721_v58 = vld [vmem:[%s1522_s3 + $0xe8] sm:$0xff]  ;;  %v722_v60 = vld [vmem:[%s1522_s3 + $0xf0] sm:$0xff]  ;;  %v723_v61 = vld [vmem:[%s1522_s3 + $0xf8] sm:$0xff] }
  0x11   :  { %1044 = vmatprep.subr.bf16.mxu1 %v1184_v3  ;;  %v1087_v59 = vpack.c.bf16 %v721_v58, %v720_v57  ;;  %v1090_v62 = vpack.c.bf16 %v723_v61, %v722_v60  ;;  %v707_v63 = vld [vmem:[%s1520_s1 + $0x8] sm:$0xff]  ;;  %v726_v5 = vld [vmem:[%s1522_s3 + $0x100] sm:$0xff]  ;;  %v729_v10 = vld [vmem:[%s1522_s3 + $0x118] sm:$0xff] }
  0x12   :  { %v727_v8 = vld [vmem:[%s1522_s3 + $0x108] sm:$0xff]  ;;  %v730_v13 = vld [vmem:[%s1522_s3 + $0x120] sm:$0xff]  ;;  %v732_v16 = vld [vmem:[%s1522_s3 + $0x130] sm:$0xff] }
  0x13   :  { %v1099_v9 = vpack.c.bf16 %v727_v8, %v726_v5  ;;  %v731_v14 = vld [vmem:[%s1522_s3 + $0x128] sm:$0xff]  ;;  %v734_v19 = vld [vmem:[%s1522_s3 + $0x140] sm:$0xff]  ;;  %v736_v22 = vld [vmem:[%s1522_s3 + $0x150] sm:$0xff] }
  0x14   :  { %1046 = vmatpush3.bf16.msra.mxu1 %v1045_v17  ;;  %v1105_v15 = vpack.c.bf16 %v731_v14, %v730_v13  ;;  %v733_v17 = vld [vmem:[%s1522_s3 + $0x138] sm:$0xff]  ;;  %v738_v25 = vld [vmem:[%s1522_s3 + $0x160] sm:$0xff]  ;;  %v740_v28 = vld [vmem:[%s1522_s3 + $0x170] sm:$0xff] }
  0x15   :  { %1047 = vmatprep.subr.bf16.mxu1 %v1184_v3  ;;  %v1108_v18 = vpack.c.bf16 %v733_v17, %v732_v16  ;;  %v725_v31 = vld [vmem:[%s1520_s1 + $0x10] sm:$0xff]  ;;  %v752_v48 = vld [vmem:[%s1522_s3 + $0x1c0] sm:$0xff]  ;;  %v753_v49 = vld [vmem:[%s1522_s3 + $0x1c8] sm:$0xff] }
  0x16   :  { %v746_v38 = vld [vmem:[%s1522_s3 + $0x190] sm:$0xff]  ;;  %v755_v52 = vld [vmem:[%s1522_s3 + $0x1d8] sm:$0xff]  ;;  %v756_v54 = vld [vmem:[%s1522_s3 + $0x1e0] sm:$0xff] }
  0x17   :  { %v750_v46 = vld [vmem:[%s1522_s3 + $0x1b0] sm:$0xff]  ;;  %v757_v55 = vld [vmem:[%s1522_s3 + $0x1e8] sm:$0xff]  ;;  %v759_v58 = vld [vmem:[%s1522_s3 + $0x1f8] sm:$0xff] }
  0x18   :  { %1049 = vmatpush3.bf16.msra.mxu1 %v1048_v20  ;;  %v735_v20 = vld [vmem:[%s1522_s3 + $0x148] sm:$0xff]  ;;  %v754_v51 = vld [vmem:[%s1522_s3 + $0x1d0] sm:$0xff]  ;;  %v743_v60 = vld [vmem:[%s1520_s1 + $0x18] sm:$0xff]  ;;  %s1187_s1 = smov [#allocation2]  }
  0x19   :  { %1050 = vmatprep.subr.bf16.mxu1 %v1184_v3  ;;  %v1111_v21 = vpack.c.bf16 %v735_v20, %v734_v19  ;;  %v758_v57 = vld [vmem:[%s1522_s3 + $0x1f0] sm:$0xff] }
  0x1c   :  { %1052 = vmatpush3.bf16.msra.mxu1 %v1051_v23  ;;  %v737_v23 = vld [vmem:[%s1522_s3 + $0x158] sm:$0xff] }
  0x1d   :  { %1053 = vmatprep.subr.bf16.mxu1 %v1184_v3  ;;  %v1114_v24 = vpack.c.bf16 %v737_v23, %v736_v22 }
  0x20   :  { %1055 = vmatpush3.bf16.msra.mxu1 %v1054_v26  ;;  %v739_v26 = vld [vmem:[%s1522_s3 + $0x168] sm:$0xff] }
  0x21   :  { %1056 = vmatprep.subr.bf16.mxu1 %v1184_v3  ;;  %v1117_v27 = vpack.c.bf16 %v739_v26, %v738_v25 }
  0x24   :  { %1058 = vmatpush3.bf16.msra.mxu1 %v1057_v29  ;;  %v741_v29 = vld [vmem:[%s1522_s3 + $0x178] sm:$0xff] }
  0x25   :  { %1059 = vmatprep.subr.bf16.mxu1 %v1184_v3  ;;  %v1120_v30 = vpack.c.bf16 %v741_v29, %v740_v28 }
  0x28   :  { %1061 = vmatpush3.bf16.msra.mxu1 %v1060_v32 }
  0x29   :  { %1092 = vmatprep.subr.bf16.mxu1 %v1184_v3 }
  0xde   :  { %v93_v34 = vpop.f32.mrb[0].mxu1 }
  0xdf   :  { %v98_v35 = vmul.f32 %v97_v33, %v93_v34  ;;  %v858_v36 = vpop.f32.mrb[1].mxu1 }
  0xe0   :  { %v745_v36 = vld [vmem:[%s1522_s3 + $0x188] sm:$0xff] }
  0xe1   :  { %892 = vmatmul.mubr.f32.vlgmr.msra.gmra.mrb[2].mxu1 %v98_v35  ;;  %v744_v35 = vld [vmem:[%s1522_s3 + $0x180] sm:$0xff] }
  0xe2   :  { %1094 = vmatpush3.bf16.msra.mxu1 %v1223_v4  ;;  %948 = vmatprep.mubr.msk.f32.mxu1 %vm1185_vm0, %v1186_v6  ;;  %v1129_v37 = vpack.c.bf16 %v745_v36, %v744_v35 }
  0xe3   :  { %1095 = vmatprep.subr.bf16.mxu1 %v1184_v3 }
  0xe6   :  { %1097 = vmatpush3.bf16.msra.mxu1 %v1234_v7 }
  0xe7   :  { %1098 = vmatprep.subr.bf16.mxu1 %v1184_v3 }
 0x1b4   :  { %v181_v42 = vpop.f32.mrb[2].mxu1 }
 0x1b5   :  { %v893_v43 = vpop.f32.mrb[3].mxu1  ;;  %903 = vmatmul.mubr.msk.f32.vlgmr.msra.gmra.mrb[0].mxu0 %vm23_vm1, %v181_v42 }
 0x1b6   :  { %1070 = vmatpush3.bf16.msra.mxu0 %v1069_v39  ;;  %937 = vmatprep.mubr.msk.f32.mxu0 %vm1185_vm0, %v1186_v6  ;;  %v747_v39 = vld [vmem:[%s1522_s3 + $0x198] sm:$0xff]  ;;  %v748_v43 = vld [vmem:[%s1522_s3 + $0x1a0] sm:$0xff] }
 0x1b7   :  { %1071 = vmatprep.subr.bf16.mxu0 %v1184_v3  ;;  %v1132_v42 = vpack.c.bf16 %v747_v39, %v746_v38 }
 0x1ba   :  { %1073 = vmatpush3.bf16.msra.mxu0 %v1072_v44  ;;  %v749_v44 = vld [vmem:[%s1522_s3 + $0x1a8] sm:$0xff] }
 0x1bb   :  { %1074 = vmatprep.subr.bf16.mxu0 %v1184_v3  ;;  %v1135_v45 = vpack.c.bf16 %v749_v44, %v748_v43 }
 0x1be   :  { %1076 = vmatpush3.bf16.msra.mxu0 %v1075_v47 }
 0x1bf   :  { %1077 = vmatprep.subr.bf16.mxu0 %v1184_v3 }
 0x1c2   :  { %1079 = vmatpush3.bf16.msra.mxu0 %v1078_v50  ;;  %v1141_v50 = vpack.c.bf16 %v753_v49, %v752_v48 }
 0x1c3   :  { %1080 = vmatprep.subr.bf16.mxu0 %v1184_v3 }
 0x1c6   :  { %1082 = vmatpush3.bf16.msra.mxu0 %v1081_v53  ;;  %v1144_v53 = vpack.c.bf16 %v755_v52, %v754_v51 }
 0x1c7   :  { %1083 = vmatprep.subr.bf16.mxu0 %v1184_v3 }
 0x1ca   :  { %1085 = vmatpush3.bf16.msra.mxu0 %v1084_v56  ;;  %v1147_v56 = vpack.c.bf16 %v757_v55, %v756_v54 }
 0x1cb   :  { %1086 = vmatprep.subr.bf16.mxu0 %v1184_v3 }
 0x1ce   :  { %1088 = vmatpush3.bf16.msra.mxu0 %v1087_v59  ;;  %v1150_v59 = vpack.c.bf16 %v759_v58, %v758_v57 }
 0x1cf   :  { %1089 = vmatprep.subr.bf16.mxu0 %v1184_v3 }
 0x1d2   :  { %1091 = vmatpush3.bf16.msra.mxu0 %v1090_v62 }
 0x1d3   :  { %1122 = vmatprep.subr.bf16.mxu0 %v1184_v3 }
 0x288   :  { %v254_v0 = vpop.f32.mrb[0].mxu0 }
 0x289   :  { %v260_v1 = vmul.f32 %v707_v63, %v254_v0  ;;  %v904_v2 = vpop.f32.mrb[1].mxu0  ;;  %v674_v0 = vlaneseq }
 0x28b   :  { %938 = vmatmul.mubr.f32.vlgmr.msra.gmra.mrb[2].mxu0 %v260_v1 }
 0x28c   :  { %1124 = vmatpush3.bf16.msra.mxu0 %v1223_v4  ;;  %994 = vmatprep.mubr.msk.f32.mxu0 %vm1185_vm0, %v1186_v6  ;;  %v728_v4 = vld [vmem:[%s1522_s3 + $0x110] sm:$0xff] }
 0x28d   :  { %1125 = vmatprep.subr.bf16.mxu0 %v1184_v3  ;;  %v1102_v12 = vpack.c.bf16 %v729_v10, %v728_v4 }
 0x290   :  { %1127 = vmatpush3.bf16.msra.mxu0 %v1234_v7 }
 0x291   :  { %1128 = vmatprep.subr.bf16.mxu0 %v1184_v3 }
 0x35e   :  { %v344_v7 = vpop.f32.mrb[2].mxu0 }
 0x35f   :  { %v939_v11 = vpop.f32.mrb[3].mxu0  ;;  %949 = vmatmul.mubr.msk.f32.vlgmr.msra.gmra.mrb[4].mxu1 %vm23_vm1, %v344_v7 }
 0x360   :  { %1100 = vmatpush3.bf16.msra.mxu1 %v1099_v9  ;;  %983 = vmatprep.mubr.msk.f32.mxu1 %vm1185_vm0, %v1186_v6 }
 0x361   :  { %1101 = vmatprep.subr.bf16.mxu1 %v1184_v3 }
 0x364   :  { %1103 = vmatpush3.bf16.msra.mxu1 %v1102_v12 }
 0x365   :  { %1104 = vmatprep.subr.bf16.mxu1 %v1184_v3 }
 0x368   :  { %1106 = vmatpush3.bf16.msra.mxu1 %v1105_v15 }
 0x369   :  { %1107 = vmatprep.subr.bf16.mxu1 %v1184_v3 }
 0x36c   :  { %1109 = vmatpush3.bf16.msra.mxu1 %v1108_v18 }
 0x36d   :  { %1110 = vmatprep.subr.bf16.mxu1 %v1184_v3 }
 0x370   :  { %1112 = vmatpush3.bf16.msra.mxu1 %v1111_v21 }
 0x371   :  { %1113 = vmatprep.subr.bf16.mxu1 %v1184_v3 }
 0x374   :  { %1115 = vmatpush3.bf16.msra.mxu1 %v1114_v24 }
 0x375   :  { %1116 = vmatprep.subr.bf16.mxu1 %v1184_v3 }
 0x378   :  { %1118 = vmatpush3.bf16.msra.mxu1 %v1117_v27 }
 0x379   :  { %1119 = vmatprep.subr.bf16.mxu1 %v1184_v3 }
 0x37c   :  { %1121 = vmatpush3.bf16.msra.mxu1 %v1120_v30 }
 0x432   :  { %v417_v32 = vpop.f32.mrb[4].mxu1 }
 0x433   :  { %v423_v33 = vmul.f32 %v725_v31, %v417_v32  ;;  %v950_v34 = vpop.f32.mrb[5].mxu1 }
 0x435   :  { %984 = vmatmul.mubr.f32.vlgmr.msra.gmra.mrb[6].mxu1 %v423_v33 }
 0x508   :  { %v507_v40 = vpop.f32.mrb[6].mxu1 }
 0x509   :  { %v985_v41 = vpop.f32.mrb[7].mxu1  ;;  %995 = vmatmul.mubr.msk.f32.vlgmr.msra.gmra.mrb[4].mxu0 %vm23_vm1, %v507_v40 }
 0x50a   :  { %1130 = vmatpush3.bf16.msra.mxu0 %v1129_v37  ;;  %1029 = vmatprep.mubr.msk.f32.mxu0 %vm1185_vm0, %v1186_v6  ;;  %v751_v6 = vld [vmem:[%s1522_s3 + $0x1b8] sm:$0xff]  ;;  %s697_s3 = sshll.u32 %s1187_s1, 4  ;;  %s698_s3 = int_to_ptr.vmem [resolvable:$true] %s697_s3 }
 0x50b   :  { %1131 = vmatprep.subr.bf16.mxu0 %v1184_v3  ;;  %v1138_v47 = vpack.c.bf16 %v751_v6, %v750_v46  ;;  %s1160_s21 = scalar_lea.vmem %s698_s3, 128  ;;  %p1165_p1 = scmp.lt.s32.totalorder %s698_s3, %s698_s3 }
 0x50c   :  { %p1161_p0 = scmp.ne.s32.totalorder %s698_s3, %s1160_s21  ;;  %p1166_p2 = scmp.lt.s32.totalorder %s1160_s21, %s1160_s21 }
 0x50e   :  { %1133 = vmatpush3.bf16.msra.mxu0 %v1132_v42  ;;  %p1167_p3 = por %p1166_p2, %p1165_p1 }
 0x50f   :  { %1134 = vmatprep.subr.bf16.mxu0 %v1184_v3 }
 0x510   :  { %p1168_p4 = pnand %p1167_p3, %p1161_p0 }
 0x512   :  { %1136 = vmatpush3.bf16.msra.mxu0 %v1135_v45 }
 0x513   :  { %1137 = vmatprep.subr.bf16.mxu0 %v1184_v3 }
 0x516   :  { %1139 = vmatpush3.bf16.msra.mxu0 %v1138_v47 }
 0x517   :  { %1140 = vmatprep.subr.bf16.mxu0 %v1184_v3 }
 0x51a   :  { %1142 = vmatpush3.bf16.msra.mxu0 %v1141_v50 }
 0x51b   :  { %1143 = vmatprep.subr.bf16.mxu0 %v1184_v3 }
 0x51e   :  { %1145 = vmatpush3.bf16.msra.mxu0 %v1144_v53 }
 0x51f   :  { %1146 = vmatprep.subr.bf16.mxu0 %v1184_v3 }
 0x522   :  { %1148 = vmatpush3.bf16.msra.mxu0 %v1147_v56 }
 0x523   :  { %1149 = vmatprep.subr.bf16.mxu0 %v1184_v3  ;;  %v675_v3 = vand.u32 127, %v674_v0 }
 0x525   :  { %vm676_vm2 = vcmp.lt.s32.totalorder %v675_v3, 10 }
 0x526   :  { %1151 = vmatpush3.bf16.msra.mxu0 %v1150_v59 }
 0x5dc   :  { %v580_v61 = vpop.f32.mrb[4].mxu0 }
 0x5dd   :  { %v586_v62 = vmul.f32 %v743_v60, %v580_v61  ;;  %v996_v63 = vpop.f32.mrb[5].mxu0 }
 0x5df   :  { %1030 = vmatmul.mubr.f32.vlgmr.msra.gmra.mrb[6].mxu0 %v586_v62 }
 0x6b2   :  { %v670_v1 = vpop.f32.mrb[6].mxu0 }
 0x6b3   :  { %v677_v2 = vsel %vm676_vm2, %v670_v1, -1e+30  ;;  %v1031_v5 = vpop.f32.mrb[7].mxu0 }
 0x6b4   :  { %v678_v8 = vsel %vm23_vm1, %v677_v2, -inf }
 0x6b5   :  { %679 = vmax.xlane.f32.xlu0 %v678_v8 }
 0x742   :  { %v680_v9 = vpop.xlane.xlu0 %679 }
 0x743   :  { %v681_v4 = vsub.f32 %v677_v2, %v680_v9 }
 0x745   :  { %v682_v10 = vmul.f32 1.442695, %v681_v4 }
 0x747   :  { %1156 = vpow2.f32 %v682_v10 }
 0x751   :  { %v1157_v7 = vpop.eup %1156 }
 0x752   :  { %v684_v11 = vsel %vm23_vm1, %v1157_v7, 0.0 }
 0x753   :  { %685 = vadd.xlane.f32.xlu0 %v684_v11 }
 0x7e0   :  { %v686_v12 = vpop.xlane.xlu0 %685 }
 0x7e1   :  { %1158 = vlog2.f32 %v686_v12 }
 0x7eb   :  { %v1159_v13 = vpop.eup %1158 }
 0x7ec   :  { %v688_v14 = vmul.f32 0.6931472, %v1159_v13 }
 0x7ee   :  { %v689_v15 = vsub.f32 %v681_v4, %v688_v14 }
 0x7f0   :  { %690 = vst.msk [vmem:[#allocation2] sm:$0xff] %vm23_vm1, %v689_v15 }
 0x7f1   :  { %1171 = shalt.err (!%p1168_p4)
}
 0x7f2   :  { %s1172_s2 = scalar_lea.hbm %s1523_s4, 128 }
 0x7f3   :  { %p1173_p5 = scmp.ne.s32.totalorder %s1523_s4, %s1172_s2  ;;  %p1176_p6 = scmp.lt.u32.totalorder %s1172_s2, %s1523_s4 }
 0x7f5   :  { %p1178_p7 = pnand %p1176_p6, %p1173_p5 }
 0x7f7   :  { %1181 = shalt.err (!%p1178_p7)
}
 0x7f8   :  { %700 = dma.vmem_to_hbm [thread:$0]  %s698_s3, 128, %s1523_s4, [#allocation3]  }
 0x7f9   :  { %1182 = dma.done.wait [#allocation3], 128  }
 0x7fa   :  { %1183 = vsyncadd [#allocation3], 4294967168 }
 0x7fb   :  { %704 = vsyncpa [#allocation3], 1 }

</bundles_post_ra>
